<compile_context>
chip_gen: v5e
topology: v5e:2x2
jax: 0.10.0
libtpu: 0.0.40
codegen_flags: <defaults>
</compile_context>

<pallas_src>
import functools

import jax
import jax.numpy as jnp
from jax import lax
from jax.experimental import pallas as pl
from jax.experimental.pallas import tpu as pltpu


def _cdiv(a, b):
    return -(-a // b)


def _round_up(x, m):
    return ((x + m - 1) // m) * m


def _choose_tiling(batch, tile_cap=1024, min_tile=16):
    """Adaptive batch tiling.

    ~tile_cap rows per tile, tile rounded up to a multiple of min_tile (bf16
    sublane pairs), and — when the batch is big enough — an even number of
    tiles so the "parallel" batch axis can shard across the two TensorCores
    on v7x (harmless on single-TC v5e/v6e)."""
    n_tiles = max(1, _cdiv(batch, tile_cap))
    if n_tiles == 1 and batch >= 4 * min_tile:
        n_tiles = 2
    if n_tiles > 1 and n_tiles % 2:
        n_tiles += 1
    tile_b = _round_up(_cdiv(batch, n_tiles), min_tile)
    return n_tiles, tile_b, n_tiles * tile_b


def trading_kernel(
    tech_ref,                   # (TILE_B, T)   compute dtype (bf16 or f32)
    sent_ref,                   # (TILE_B, S)   compute dtype
    wte_ref,                    # (T, 2H)   tech encoder -> lanes [:H], zeros elsewhere
    wse_ref,                    # (S, 2H)   sent encoder -> lanes [H:], zeros elsewhere
    wproj_ref,                  # (2H, 2P)  block-diag shared projection
    wd1_ref,                    # (P, Hd)   decision fc1
    small_ref,                  # (8, >=128) f32 packed small params
    out_ref,                    # (TILE_B, OUT_W) lane-dense output slab
    *, enc_hidden, proj_dim, dec_hidden, out_width,
):
    f32 = jnp.float32
    H, P, Hd = enc_hidden, proj_dim, dec_hidden

    # --- unpack the single packed small-parameter tile (all f32) ---
    b_enc  = small_ref[0:1, :2 * H]
    b_proj = small_ref[1:2, :2 * P]
    wg1    = small_ref[2:3, :16]
    bg1    = small_ref[3:4, :16]
    wg2    = small_ref[4:5, :16]
    wd2    = small_ref[5:6, :Hd]
    bg2    = small_ref[6:7, 0:1]
    bd2    = small_ref[6:7, 1:2]
    bd1    = small_ref[7:8, :Hd]

    # --- fused encoders: accumulate both streams into one [h_t | h_s] tile ---
    h_pre = (jnp.dot(tech_ref[...], wte_ref[...], preferred_element_type=f32)
             + jnp.dot(sent_ref[...], wse_ref[...], preferred_element_type=f32)
             + b_enc)
    h = jnp.maximum(h_pre, 0.0)                                       # f32
    # (dropout = identity in eval mode)

    # --- fused shared projection head: [p_t | p_s] ---
    p = jnp.maximum(
        jnp.dot(h.astype(wproj_ref.dtype), wproj_ref[...],
                preferred_element_type=f32) + b_proj, 0.0)            # f32
    p_t = p[:, :P]
    p_s = p[:, P:]

    # --- adaptive fusion: cosine similarity (rsqrt -> EUP slot) ---
    eps = 1e-8
    dotp  = jnp.sum(p_t * p_s, axis=1, keepdims=True)
    nsq_t = jnp.sum(p_t * p_t, axis=1, keepdims=True)
    nsq_s = jnp.sum(p_s * p_s, axis=1, keepdims=True)
    cos = dotp * lax.rsqrt(jnp.maximum(nsq_t * nsq_s, eps * eps))
    contra = 1.0 - cos                                                # (TILE_B, 1)

    # --- gate MLP: Linear(1,16) + ReLU + Linear(16,1) + Sigmoid (VPU only) ---
    g_h = jnp.maximum(contra * wg1 + bg1, 0.0)                        # (TILE_B, 16)
    gate = jax.nn.sigmoid(jnp.sum(g_h * wg2, axis=1, keepdims=True) + bg2)

    fused = gate * p_t + (1.0 - gate) * p_s                           # f32

    # --- decision head: Linear + ReLU + Linear(., 1) ---
    d_h = jnp.maximum(
        jnp.dot(fused.astype(wd1_ref.dtype), wd1_ref[...],
                preferred_element_type=f32) + bd1, 0.0)
    dec = jnp.sum(d_h * wd2, axis=1, keepdims=True) + bd2

    # --- pack one lane-dense slab: [p_t | p_s | dec | contra | gate | 0...] ---
    tb = p.shape[0]
    tail_w = out_width - 2 * P
    lane = lax.broadcasted_iota(jnp.int32, (tb, tail_w), 1)
    tail = (jnp.where(lane == 0, dec, 0.0)
            + jnp.where(lane == 1, contra, 0.0)
            + jnp.where(lane == 2, gate, 0.0))
    out_ref[...] = jnp.concatenate([p, tail], axis=1).astype(out_ref.dtype)


def _uniform(key, shape, fan_in):
    bound = 1.0 / jnp.sqrt(jnp.float32(fan_in))
    return jax.random.uniform(key, shape, jnp.float32, -bound, bound)


def init_params(key, tech_dim, sent_dim, enc_hidden, proj_dim, dec_hidden):
    ks = jax.random.split(key, 16)
    p = {}
    # stored as [in, out] (already transposed vs. PyTorch's [out, in])
    p["wte"] = _uniform(ks[0], (tech_dim, enc_hidden), tech_dim)
    p["bte"] = _uniform(ks[1], (1, enc_hidden), tech_dim)
    p["wse"] = _uniform(ks[2], (sent_dim, enc_hidden), sent_dim)
    p["bse"] = _uniform(ks[3], (1, enc_hidden), sent_dim)
    p["wp"] = _uniform(ks[4], (enc_hidden, proj_dim), enc_hidden)
    p["bp"] = _uniform(ks[5], (1, proj_dim), enc_hidden)
    p["wg1"] = _uniform(ks[6], (1, 16), 1)            # Linear(1,16)
    p["bg1"] = _uniform(ks[7], (1, 16), 1)
    p["wg2"] = _uniform(ks[8], (1, 16), 16)           # Linear(16,1) stored as [1,16]
    p["bg2"] = _uniform(ks[9], (1, 1), 16)
    p["wd1"] = _uniform(ks[10], (proj_dim, dec_hidden), proj_dim)
    p["bd1"] = _uniform(ks[11], (1, dec_hidden), proj_dim)
    p["wd2"] = _uniform(ks[12], (1, dec_hidden), dec_hidden)   # Linear(Hd,1) as [1,Hd]
    p["bd2"] = _uniform(ks[13], (1, 1), dec_hidden)
    return p


def prepare_fused_params(params, compute_dtype=jnp.bfloat16):
    """One-time (per parameter update) weight prep — hoisted out of forward."""
    f32 = jnp.float32
    T, H = params["wte"].shape
    S = params["wse"].shape[0]
    P = params["wp"].shape[1]
    Hd = params["wd1"].shape[1]

    # block-diagonal encoder split into its two input-stream factors
    wte_f = jnp.zeros((T, 2 * H), f32).at[:, :H].set(params["wte"])
    wse_f = jnp.zeros((S, 2 * H), f32).at[:, H:].set(params["wse"])
    # shared projection applied to both halves block-diagonally
    w_proj = (jnp.zeros((2 * H, 2 * P), f32)
              .at[:H, :P].set(params["wp"])
              .at[H:, P:].set(params["wp"]))

    # pack all tiny parameters into one lane-padded f32 tile (one DMA)
    small_w = _round_up(max(2 * H, 2 * P, Hd, 16), 128)
    small = jnp.zeros((8, small_w), f32)
    small = small.at[0, :2 * H].set(
        jnp.concatenate([params["bte"][0], params["bse"][0]]))
    small = small.at[1, :2 * P].set(
        jnp.concatenate([params["bp"][0], params["bp"][0]]))
    small = small.at[2, :16].set(params["wg1"][0])
    small = small.at[3, :16].set(params["bg1"][0])
    small = small.at[4, :16].set(params["wg2"][0])
    small = small.at[5, :Hd].set(params["wd2"][0])
    small = small.at[6, 0].set(params["bg2"][0, 0])
    small = small.at[6, 1].set(params["bd2"][0, 0])
    small = small.at[7, :Hd].set(params["bd1"][0])

    return {
        "wte": wte_f.astype(compute_dtype),
        "wse": wse_f.astype(compute_dtype),
        "w_proj": w_proj.astype(compute_dtype),
        "wd1": params["wd1"].astype(compute_dtype),
        "small": small,                       # stays f32
        "dims": (T, S, H, P, Hd),
        "compute_dtype": compute_dtype,
    }


def trading_model_forward(tech, sent, fused, *, tile_cap=1024):
    T, S, H, P, Hd = fused["dims"]
    cdt = fused["compute_dtype"]
    B = tech.shape[0]

    n_tiles, tile_b, b_pad = _choose_tiling(B, tile_cap)
    tech_x = tech.astype(cdt)
    sent_x = sent.astype(cdt)
    if b_pad != B:                      # small residual pad only (adaptive tiles)
        pad = ((0, b_pad - B), (0, 0))
        tech_x = jnp.pad(tech_x, pad)
        sent_x = jnp.pad(sent_x, pad)

    out_w = _round_up(2 * P + 3, 128)   # lane-dense output slab width
    small = fused["small"]

    kernel = functools.partial(
        trading_kernel, enc_hidden=H, proj_dim=P, dec_hidden=Hd, out_width=out_w)

    slab = pl.pallas_call(
        kernel,
        out_shape=jax.ShapeDtypeStruct((b_pad, out_w), cdt),
        grid=(n_tiles,),
        in_specs=[
            pl.BlockSpec((tile_b, T), lambda i: (i, 0)),       # tech block
            pl.BlockSpec((tile_b, S), lambda i: (i, 0)),       # sent block
            pl.BlockSpec((T, 2 * H), lambda i: (0, 0)),        # VMEM-resident weights
            pl.BlockSpec((S, 2 * H), lambda i: (0, 0)),
            pl.BlockSpec((2 * H, 2 * P), lambda i: (0, 0)),
            pl.BlockSpec((P, Hd), lambda i: (0, 0)),
            pl.BlockSpec(small.shape, lambda i: (0, 0)),       # packed small params
        ],
        out_specs=pl.BlockSpec((tile_b, out_w), lambda i: (i, 0)),
        compiler_params=pltpu.CompilerParams(
            dimension_semantics=("parallel",)),
    )(tech_x, sent_x, fused["wte"], fused["wse"], fused["w_proj"],
      fused["wd1"], small)

    slab = slab[:B].astype(jnp.float32)
    p_t = slab[:, :P]
    p_s = slab[:, P:2 * P]
    dec = slab[:, 2 * P:2 * P + 1]
    contra = slab[:, 2 * P + 1]            # (B,) — matches PyTorch return shape
    gate = slab[:, 2 * P + 2:2 * P + 3]
    return dec, contra, p_t, p_s, gate


def reference_forward(tech, sent, p):
    relu = lambda v: jnp.maximum(v, 0.0)
    h_t = relu(tech @ p["wte"] + p["bte"])
    h_s = relu(sent @ p["wse"] + p["bse"])
    p_t = relu(h_t @ p["wp"] + p["bp"])
    p_s = relu(h_s @ p["wp"] + p["bp"])
    eps = 1e-8
    dot = jnp.sum(p_t * p_s, axis=1, keepdims=True)
    nsq1 = jnp.sum(p_t * p_t, axis=1, keepdims=True)
    nsq2 = jnp.sum(p_s * p_s, axis=1, keepdims=True)
    cos = dot / jnp.sqrt(jnp.maximum(nsq1 * nsq2, eps * eps))
    contra = 1.0 - cos
    g_h = relu(contra * p["wg1"] + p["bg1"])
    gate = jax.nn.sigmoid(jnp.sum(g_h * p["wg2"], axis=1, keepdims=True) + p["bg2"])
    fused = gate * p_t + (1.0 - gate) * p_s
    d_h = relu(fused @ p["wd1"] + p["bd1"])
    dec = jnp.sum(d_h * p["wd2"], axis=1, keepdims=True) + p["bd2"]
    return dec, contra[:, 0], p_t, p_s, gate


if __name__ == "__main__":
    # small, module-consistent shapes
    TECH_DIM = 16
    SENT_DIM = 32
    ENC_HIDDEN = 32
    PROJ_DIM = 32
    DEC_HIDDEN = 32

    key = jax.random.PRNGKey(0)
    k_params, k_small, k_large = jax.random.split(key, 3)
    params = init_params(k_params, TECH_DIM, SENT_DIM, ENC_HIDDEN, PROJ_DIM, DEC_HIDDEN)

    # fused weights prepared once (hoisted out of the per-call forward)
    fused_f32 = prepare_fused_params(params, compute_dtype=jnp.float32)
    fused_bf16 = prepare_fused_params(params, compute_dtype=jnp.bfloat16)

    # case 1: tiny batch (single tile); case 2: batch exercising adaptive tiling
    for tag, B, k in (("small", 8, k_small), ("tiled", 600, k_large)):
        kt, ks = jax.random.split(k)
        tech = jax.random.normal(kt, (B, TECH_DIM), jnp.float32)
        sent = jax.random.normal(ks, (B, SENT_DIM), jnp.float32)
        refs = reference_forward(tech, sent, params)

        # exact-math check on the f32 path
        outs = jax.block_until_ready(trading_model_forward(tech, sent, fused_f32))
        for o, r in zip(outs, refs):
            assert o.shape == r.shape, (tag, "f32", o.shape, r.shape)
            err = float(jnp.max(jnp.abs(o - r)))
            assert jnp.allclose(o, r, atol=2e-5, rtol=2e-5), (tag, "f32", err)

        # fast path: bf16 activations/weights/output slab (looser tolerance —
        # two chained bf16 matmuls plus a bf16 output slab, ~2-3 sig. digits)
        outs = jax.block_until_ready(trading_model_forward(tech, sent, fused_bf16))
        for o, r in zip(outs, refs):
            assert o.shape == r.shape, (tag, "bf16", o.shape, r.shape)
            err = float(jnp.max(jnp.abs(o - r)))
            assert jnp.allclose(o, r, atol=1e-1, rtol=1e-1), (tag, "bf16", err)

    print("KERNEL_OK")
</pallas_src>

<mosaic_0001>
module attributes {stable_mosaic.version = 11 : i64} {
  func.func @trading_kernel(%arg0: i32, %arg1: memref<16x16xf32, #tpu.memory_space<vmem>>, %arg2: memref<16x32xf32, #tpu.memory_space<vmem>>, %arg3: memref<16x64xf32, #tpu.memory_space<vmem>>, %arg4: memref<32x64xf32, #tpu.memory_space<vmem>>, %arg5: memref<64x64xf32, #tpu.memory_space<vmem>>, %arg6: memref<32x32xf32, #tpu.memory_space<vmem>>, %arg7: memref<8x128xf32, #tpu.memory_space<vmem>>, %arg8: memref<16x128xf32, #tpu.memory_space<vmem>>) attributes {dimension_semantics = [#tpu.dimension_semantics<parallel>], iteration_bounds = array<i64: 1>, scalar_prefetch = 0 : i64, scratch_operands = 0 : i64, tpu.core_type = #tpu.core_type<tc>, window_params = [{transform_indices = @transform_0, window_bounds = array<i64: 16, 16>}, {transform_indices = @transform_1, window_bounds = array<i64: 16, 32>}, {pipeline_mode = #tpu.pipeline_mode<synchronous>, transform_indices = @transform_2, window_bounds = array<i64: 16, 64>}, {pipeline_mode = #tpu.pipeline_mode<synchronous>, transform_indices = @transform_3, window_bounds = array<i64: 32, 64>}, {pipeline_mode = #tpu.pipeline_mode<synchronous>, transform_indices = @transform_4, window_bounds = array<i64: 64, 64>}, {pipeline_mode = #tpu.pipeline_mode<synchronous>, transform_indices = @transform_5, window_bounds = array<i64: 32, 32>}, {pipeline_mode = #tpu.pipeline_mode<synchronous>, transform_indices = @transform_6, window_bounds = array<i64: 8, 128>}, {transform_indices = @transform_7, window_bounds = array<i64: 16, 128>}]} {
    %c0 = arith.constant 0 : index
    %c0_0 = arith.constant 0 : index
    %0 = vector.load %arg7[%c0, %c0_0] : memref<8x128xf32, #tpu.memory_space<vmem>>, vector<1x64xf32>
    %c1 = arith.constant 1 : index
    %c0_1 = arith.constant 0 : index
    %1 = vector.load %arg7[%c1, %c0_1] : memref<8x128xf32, #tpu.memory_space<vmem>>, vector<1x64xf32>
    %c2 = arith.constant 2 : index
    %c0_2 = arith.constant 0 : index
    %2 = vector.load %arg7[%c2, %c0_2] : memref<8x128xf32, #tpu.memory_space<vmem>>, vector<1x16xf32>
    %c3 = arith.constant 3 : index
    %c0_3 = arith.constant 0 : index
    %3 = vector.load %arg7[%c3, %c0_3] : memref<8x128xf32, #tpu.memory_space<vmem>>, vector<1x16xf32>
    %c4 = arith.constant 4 : index
    %c0_4 = arith.constant 0 : index
    %4 = vector.load %arg7[%c4, %c0_4] : memref<8x128xf32, #tpu.memory_space<vmem>>, vector<1x16xf32>
    %c5 = arith.constant 5 : index
    %c0_5 = arith.constant 0 : index
    %5 = vector.load %arg7[%c5, %c0_5] : memref<8x128xf32, #tpu.memory_space<vmem>>, vector<1x32xf32>
    %c6 = arith.constant 6 : index
    %c0_6 = arith.constant 0 : index
    %6 = vector.load %arg7[%c6, %c0_6] : memref<8x128xf32, #tpu.memory_space<vmem>>, vector<1x1xf32>
    %c6_7 = arith.constant 6 : index
    %c1_8 = arith.constant 1 : index
    %7 = vector.load %arg7[%c6_7, %c1_8] : memref<8x128xf32, #tpu.memory_space<vmem>>, vector<1x1xf32>
    %c7 = arith.constant 7 : index
    %c0_9 = arith.constant 0 : index
    %8 = vector.load %arg7[%c7, %c0_9] : memref<8x128xf32, #tpu.memory_space<vmem>>, vector<1x32xf32>
    %c0_10 = arith.constant 0 : index
    %c0_11 = arith.constant 0 : index
    %9 = vector.load %arg1[%c0_10, %c0_11] : memref<16x16xf32, #tpu.memory_space<vmem>>, vector<16x16xf32>
    %c0_12 = arith.constant 0 : index
    %c0_13 = arith.constant 0 : index
    %10 = vector.load %arg3[%c0_12, %c0_13] : memref<16x64xf32, #tpu.memory_space<vmem>>, vector<16x64xf32>
    %cst = arith.constant dense<0.000000e+00> : vector<16x64xf32>
    %11 = tpu.matmul %9, %10, %cst {dimension_numbers = #tpu.dot_dimension_numbers<[1], [0], [0], [1], [0, 0, 1, 1], [], []>} : vector<16x16xf32>, vector<16x64xf32>, vector<16x64xf32> -> vector<16x64xf32>
    %c0_14 = arith.constant 0 : index
    %c0_15 = arith.constant 0 : index
    %12 = vector.load %arg2[%c0_14, %c0_15] : memref<16x32xf32, #tpu.memory_space<vmem>>, vector<16x32xf32>
    %c0_16 = arith.constant 0 : index
    %c0_17 = arith.constant 0 : index
    %13 = vector.load %arg4[%c0_16, %c0_17] : memref<32x64xf32, #tpu.memory_space<vmem>>, vector<32x64xf32>
    %cst_18 = arith.constant dense<0.000000e+00> : vector<16x64xf32>
    %14 = tpu.matmul %12, %13, %cst_18 {dimension_numbers = #tpu.dot_dimension_numbers<[1], [0], [0], [1], [0, 0, 1, 1], [], []>} : vector<16x32xf32>, vector<32x64xf32>, vector<16x64xf32> -> vector<16x64xf32>
    %15 = arith.addf %11, %14 : vector<16x64xf32>
    %16 = vector.broadcast %0 : vector<1x64xf32> to vector<16x64xf32>
    %17 = arith.addf %15, %16 : vector<16x64xf32>
    %cst_19 = arith.constant 0.000000e+00 : f32
    %18 = vector.broadcast %cst_19 : f32 to vector<16x64xf32>
    %19 = arith.maximumf %17, %18 : vector<16x64xf32>
    %c0_20 = arith.constant 0 : index
    %c0_21 = arith.constant 0 : index
    %20 = vector.load %arg5[%c0_20, %c0_21] : memref<64x64xf32, #tpu.memory_space<vmem>>, vector<64x64xf32>
    %cst_22 = arith.constant dense<0.000000e+00> : vector<16x64xf32>
    %21 = tpu.matmul %19, %20, %cst_22 {dimension_numbers = #tpu.dot_dimension_numbers<[1], [0], [0], [1], [0, 0, 1, 1], [], []>} : vector<16x64xf32>, vector<64x64xf32>, vector<16x64xf32> -> vector<16x64xf32>
    %22 = vector.broadcast %1 : vector<1x64xf32> to vector<16x64xf32>
    %23 = arith.addf %21, %22 : vector<16x64xf32>
    %cst_23 = arith.constant 0.000000e+00 : f32
    %24 = vector.broadcast %cst_23 : f32 to vector<16x64xf32>
    %25 = arith.maximumf %23, %24 : vector<16x64xf32>
    %26 = vector.extract_strided_slice %25 {offsets = [0, 0], sizes = [16, 32], strides = [1, 1]} : vector<16x64xf32> to vector<16x32xf32>
    %27 = vector.extract_strided_slice %25 {offsets = [0, 32], sizes = [16, 32], strides = [1, 1]} : vector<16x64xf32> to vector<16x32xf32>
    %28 = arith.mulf %26, %27 : vector<16x32xf32>
    %cst_24 = arith.constant dense<0.000000e+00> : vector<16xf32>
    %29 = vector.multi_reduction <add>, %28, %cst_24 [1] : vector<16x32xf32> to vector<16xf32>
    %30 = vector.shape_cast %29 : vector<16xf32> to vector<16x1xf32>
    %31 = arith.mulf %26, %26 : vector<16x32xf32>
    %cst_25 = arith.constant dense<0.000000e+00> : vector<16xf32>
    %32 = vector.multi_reduction <add>, %31, %cst_25 [1] : vector<16x32xf32> to vector<16xf32>
    %33 = vector.shape_cast %32 : vector<16xf32> to vector<16x1xf32>
    %34 = arith.mulf %27, %27 : vector<16x32xf32>
    %cst_26 = arith.constant dense<0.000000e+00> : vector<16xf32>
    %35 = vector.multi_reduction <add>, %34, %cst_26 [1] : vector<16x32xf32> to vector<16xf32>
    %36 = vector.shape_cast %35 : vector<16xf32> to vector<16x1xf32>
    %37 = arith.mulf %33, %36 : vector<16x1xf32>
    %cst_27 = arith.constant 1.000000e-16 : f32
    %38 = vector.broadcast %cst_27 : f32 to vector<16x1xf32>
    %39 = arith.maximumf %37, %38 : vector<16x1xf32>
    %40 = math.rsqrt %39 : vector<16x1xf32>
    %41 = arith.mulf %30, %40 : vector<16x1xf32>
    %cst_28 = arith.constant 1.000000e+00 : f32
    %42 = vector.broadcast %cst_28 : f32 to vector<16x1xf32>
    %43 = arith.subf %42, %41 : vector<16x1xf32>
    %44 = vector.broadcast %43 : vector<16x1xf32> to vector<16x16xf32>
    %45 = vector.broadcast %2 : vector<1x16xf32> to vector<16x16xf32>
    %46 = arith.mulf %44, %45 : vector<16x16xf32>
    %47 = vector.broadcast %3 : vector<1x16xf32> to vector<16x16xf32>
    %48 = arith.addf %46, %47 : vector<16x16xf32>
    %cst_29 = arith.constant 0.000000e+00 : f32
    %49 = vector.broadcast %cst_29 : f32 to vector<16x16xf32>
    %50 = arith.maximumf %48, %49 : vector<16x16xf32>
    %51 = vector.broadcast %4 : vector<1x16xf32> to vector<16x16xf32>
    %52 = arith.mulf %50, %51 : vector<16x16xf32>
    %cst_30 = arith.constant dense<0.000000e+00> : vector<16xf32>
    %53 = vector.multi_reduction <add>, %52, %cst_30 [1] : vector<16x16xf32> to vector<16xf32>
    %54 = vector.shape_cast %53 : vector<16xf32> to vector<16x1xf32>
    %55 = vector.broadcast %6 : vector<1x1xf32> to vector<16x1xf32>
    %56 = arith.addf %54, %55 : vector<16x1xf32>
    %57 = arith.negf %56 : vector<16x1xf32>
    %58 = math.exp %57 : vector<16x1xf32>
    %cst_31 = arith.constant 1.000000e+00 : f32
    %59 = vector.broadcast %cst_31 : f32 to vector<16x1xf32>
    %60 = arith.addf %59, %58 : vector<16x1xf32>
    %61 = arith.divf %59, %60 : vector<16x1xf32>
    %62 = vector.broadcast %61 : vector<16x1xf32> to vector<16x32xf32>
    %63 = arith.mulf %62, %26 : vector<16x32xf32>
    %cst_32 = arith.constant 1.000000e+00 : f32
    %64 = vector.broadcast %cst_32 : f32 to vector<16x1xf32>
    %65 = arith.subf %64, %61 : vector<16x1xf32>
    %66 = vector.broadcast %65 : vector<16x1xf32> to vector<16x32xf32>
    %67 = arith.mulf %66, %27 : vector<16x32xf32>
    %68 = arith.addf %63, %67 : vector<16x32xf32>
    %c0_33 = arith.constant 0 : index
    %c0_34 = arith.constant 0 : index
    %69 = vector.load %arg6[%c0_33, %c0_34] : memref<32x32xf32, #tpu.memory_space<vmem>>, vector<32x32xf32>
    %cst_35 = arith.constant dense<0.000000e+00> : vector<16x32xf32>
    %70 = tpu.matmul %68, %69, %cst_35 {dimension_numbers = #tpu.dot_dimension_numbers<[1], [0], [0], [1], [0, 0, 1, 1], [], []>} : vector<16x32xf32>, vector<32x32xf32>, vector<16x32xf32> -> vector<16x32xf32>
    %71 = vector.broadcast %8 : vector<1x32xf32> to vector<16x32xf32>
    %72 = arith.addf %70, %71 : vector<16x32xf32>
    %cst_36 = arith.constant 0.000000e+00 : f32
    %73 = vector.broadcast %cst_36 : f32 to vector<16x32xf32>
    %74 = arith.maximumf %72, %73 : vector<16x32xf32>
    %75 = vector.broadcast %5 : vector<1x32xf32> to vector<16x32xf32>
    %76 = arith.mulf %74, %75 : vector<16x32xf32>
    %cst_37 = arith.constant dense<0.000000e+00> : vector<16xf32>
    %77 = vector.multi_reduction <add>, %76, %cst_37 [1] : vector<16x32xf32> to vector<16xf32>
    %78 = vector.shape_cast %77 : vector<16xf32> to vector<16x1xf32>
    %79 = vector.broadcast %7 : vector<1x1xf32> to vector<16x1xf32>
    %80 = arith.addf %78, %79 : vector<16x1xf32>
    %81 = tpu.iota {dimensions = array<i32: 1>} : vector<16x64xi32>
    %c0_i32 = arith.constant 0 : i32
    %82 = vector.broadcast %c0_i32 : i32 to vector<16x64xi32>
    %83 = arith.cmpi eq, %81, %82 : vector<16x64xi32>
    %cst_38 = arith.constant 0.000000e+00 : f32
    %84 = vector.shape_cast %80 : vector<16x1xf32> to vector<16x1xf32>
    %85 = vector.broadcast %84 : vector<16x1xf32> to vector<16x64xf32>
    %86 = vector.broadcast %cst_38 : f32 to vector<16x64xf32>
    %87 = arith.select %83, %85, %86 : vector<16x64xi1>, vector<16x64xf32>
    %c1_i32 = arith.constant 1 : i32
    %88 = vector.broadcast %c1_i32 : i32 to vector<16x64xi32>
    %89 = arith.cmpi eq, %81, %88 : vector<16x64xi32>
    %cst_39 = arith.constant 0.000000e+00 : f32
    %90 = vector.shape_cast %43 : vector<16x1xf32> to vector<16x1xf32>
    %91 = vector.broadcast %90 : vector<16x1xf32> to vector<16x64xf32>
    %92 = vector.broadcast %cst_39 : f32 to vector<16x64xf32>
    %93 = arith.select %89, %91, %92 : vector<16x64xi1>, vector<16x64xf32>
    %94 = arith.addf %87, %93 : vector<16x64xf32>
    %c2_i32 = arith.constant 2 : i32
    %95 = vector.broadcast %c2_i32 : i32 to vector<16x64xi32>
    %96 = arith.cmpi eq, %81, %95 : vector<16x64xi32>
    %cst_40 = arith.constant 0.000000e+00 : f32
    %97 = vector.shape_cast %61 : vector<16x1xf32> to vector<16x1xf32>
    %98 = vector.broadcast %97 : vector<16x1xf32> to vector<16x64xf32>
    %99 = vector.broadcast %cst_40 : f32 to vector<16x64xf32>
    %100 = arith.select %96, %98, %99 : vector<16x64xi1>, vector<16x64xf32>
    %101 = arith.addf %94, %100 : vector<16x64xf32>
    %102 = tpu.concatenate %25, %101 in 1 : vector<16x64xf32>, vector<16x64xf32> -> vector<16x128xf32>
    %c0_41 = arith.constant 0 : index
    %c0_42 = arith.constant 0 : index
    %103 = vector.load %arg8[%c0_41, %c0_42] : memref<16x128xf32, #tpu.memory_space<vmem>>, vector<16x128xf32>
    tpu.vector_store %arg8[%c0_41, %c0_42], %102 {strides = array<i32>} : memref<16x128xf32, #tpu.memory_space<vmem>>, vector<16x128xf32>,
    return
  }
  func.func @transform_0(%arg0: i32) -> (i32, i32) {
    %c0_i32 = arith.constant 0 : i32
    %c0_i32_0 = arith.constant 0 : i32
    return %arg0, %c0_i32 : i32, i32
  }
  func.func @transform_1(%arg0: i32) -> (i32, i32) {
    %c0_i32 = arith.constant 0 : i32
    %c0_i32_0 = arith.constant 0 : i32
    return %arg0, %c0_i32 : i32, i32
  }
  func.func @transform_2(%arg0: i32) -> (i32, i32) {
    %c0_i32 = arith.constant 0 : i32
    %c0_i32_0 = arith.constant 0 : i32
    %c0_i32_1 = arith.constant 0 : i32
    return %c0_i32, %c0_i32_0 : i32, i32
  }
  func.func @transform_3(%arg0: i32) -> (i32, i32) {
    %c0_i32 = arith.constant 0 : i32
    %c0_i32_0 = arith.constant 0 : i32
    %c0_i32_1 = arith.constant 0 : i32
    return %c0_i32, %c0_i32_0 : i32, i32
  }
  func.func @transform_4(%arg0: i32) -> (i32, i32) {
    %c0_i32 = arith.constant 0 : i32
    %c0_i32_0 = arith.constant 0 : i32
    %c0_i32_1 = arith.constant 0 : i32
    return %c0_i32, %c0_i32_0 : i32, i32
  }
  func.func @transform_5(%arg0: i32) -> (i32, i32) {
    %c0_i32 = arith.constant 0 : i32
    %c0_i32_0 = arith.constant 0 : i32
    %c0_i32_1 = arith.constant 0 : i32
    return %c0_i32, %c0_i32_0 : i32, i32
  }
  func.func @transform_6(%arg0: i32) -> (i32, i32) {
    %c0_i32 = arith.constant 0 : i32
    %c0_i32_0 = arith.constant 0 : i32
    %c0_i32_1 = arith.constant 0 : i32
    return %c0_i32, %c0_i32_0 : i32, i32
  }
  func.func @transform_7(%arg0: i32) -> (i32, i32) {
    %c0_i32 = arith.constant 0 : i32
    %c0_i32_0 = arith.constant 0 : i32
    return %arg0, %c0_i32 : i32, i32
  }
}

</mosaic_0001>

<bundles_post_ra>
// kernel: tpu_custom_call.1
= control target key start
LH: loop header
LB: loop body
LE: loop exit
PB: predicated region body
PF: predicated region fallthrough
CT: control target
= control target key end

     0   :  { %12 = vsyncpa [#allocation3], 0  ;;  %s945_s0 = inlined_call_operand.hbm [shape: f32[16,16], index: 0, kind: input, shape index: {}]   ;;  %s946_s1 = inlined_call_operand.hbm [shape: f32[16,32], index: 1, kind: input, shape index: {}]   ;;  %s947_s2 = inlined_call_operand.hbm [shape: f32[16,64], index: 2, kind: input, shape index: {}]   ;;  %s948_s3 = inlined_call_operand.hbm [shape: f32[32,64], index: 3, kind: input, shape index: {}]   ;;  %s949_s4 = inlined_call_operand.hbm [shape: f32[64,64], index: 4, kind: input, shape index: {}]   ;;  %s950_s5 = inlined_call_operand.hbm [shape: f32[32,32], index: 5, kind: input, shape index: {}]   ;;  %s951_s6 = inlined_call_operand.hbm [shape: f32[8,128], index: 6, kind: input, shape index: {}]   ;;  %s952_s7 = inlined_call_operand.hbm [shape: f32[16,128], index: 7, kind: output, shape index: {}]  }
   0x1   :  { %13 = vsyncpa [#allocation6], 0 }
   0x2   :  { %14 = vsyncpa [#allocation9], 0 }
   0x3   :  { %15 = vsyncpa [#allocation12], 0 }
   0x4   :  { %16 = vsyncpa [#allocation4], 0  ;;  %s34_s26 = sshll.u32 %s946_s1, 4  ;;  %s782_s27 = smov [#allocation5]   ;;  %s35_s26 = int_to_ptr.hbm [resolvable:$true] %s34_s26 }
   0x5   :  { %s36_s28 = sshll.u32 %s782_s27, 4  ;;  %s60_s8 = sshll.u32 %s948_s3, 4  ;;  %s37_s28 = int_to_ptr.vmem [resolvable:$true] %s36_s28  ;;  %s61_s8 = int_to_ptr.hbm [resolvable:$true] %s60_s8 }
   0x6   :  { %s783_s9 = smov 128   ;;  %s784_s10 = smov 8  }
   0x7   :  { %42 = dma.hbm_to_vmem [thread:$0]  %s35_s26, 256, %s37_s28, [#allocation6], %s783_s9, %s783_s9, %s784_s10  }
   0x8   :  { %s785_s11 = smov [#allocation8]   ;;  %s86_s1 = sshll.u32 %s950_s5, 4  ;;  %s87_s1 = int_to_ptr.hbm [resolvable:$true] %s86_s1 }
   0x9   :  { %s62_s12 = sshll.u32 %s785_s11, 4  ;;  %s21_s16 = sshll.u32 %s945_s0, 4  ;;  %s63_s12 = int_to_ptr.vmem [resolvable:$true] %s62_s12  ;;  %s22_s16 = int_to_ptr.hbm [resolvable:$true] %s21_s16 }
   0xa   :  { %68 = dma.hbm_to_vmem [thread:$0]  %s61_s8, 512, %s63_s12, [#allocation9], %s783_s9, %s783_s9, %s784_s10  }
   0xb   :  { %s786_s17 = smov [#allocation11]   ;;  %s787_s19 = smov [#allocation2]  }
   0xc   :  { %s88_s18 = sshll.u32 %s786_s17, 4  ;;  %s23_s5 = sshll.u32 %s787_s19, 4  ;;  %s89_s18 = int_to_ptr.vmem [resolvable:$true] %s88_s18  ;;  %s24_s5 = int_to_ptr.vmem [resolvable:$true] %s23_s5 }
   0xd   :  { %94 = dma.hbm_to_vmem [thread:$0]  %s87_s1, 512, %s89_s18, [#allocation12], %s783_s9, %s783_s9, %s784_s10  }
   0xe   :  { %s47_s22 = sshll.u32 %s947_s2, 4  ;;  %s73_s24 = sshll.u32 %s949_s4, 4  ;;  %s48_s22 = int_to_ptr.hbm [resolvable:$true] %s47_s22  ;;  %s74_s24 = int_to_ptr.hbm [resolvable:$true] %s73_s24 }
   0xf   :  { %29 = dma.hbm_to_vmem [thread:$0]  %s22_s16, 256, %s24_s5, [#allocation3], %s783_s9, %s783_s9, %s784_s10  }
  0x10   :  { %s788_s25 = smov [#allocation7]   ;;  %s789_s27 = smov [#allocation10]  }
  0x11   :  { %s49_s26 = sshll.u32 %s788_s25, 4  ;;  %s75_s2 = sshll.u32 %s789_s27, 4  ;;  %s50_s26 = int_to_ptr.vmem [resolvable:$true] %s49_s26  ;;  %s76_s2 = int_to_ptr.vmem [resolvable:$true] %s75_s2 }
  0x12   :  { %55 = dma.hbm_to_vmem [thread:$0]  %s48_s22, 256, %s50_s26, [#allocation6], %s783_s9, %s783_s9, %s784_s10  }
  0x13   :  { %s100_s30 = sshll.u32 %s951_s6, 4  ;;  %s790_s4 = smov [#allocation13]   ;;  %s101_s30 = int_to_ptr.hbm [resolvable:$true] %s100_s30 }
  0x14   :  { %81 = dma.hbm_to_vmem [thread:$0]  %s74_s24, 1024, %s76_s2, [#allocation9], %s783_s9, %s783_s9, %s784_s10  }
  0x15   :  { %s102_s8 = sshll.u32 %s790_s4, 4  ;;  %s103_s8 = int_to_ptr.vmem [resolvable:$true] %s102_s8 }
  0x16   :  { %105 = dma.hbm_to_vmem [thread:$0]  %s101_s30, 128, %s103_s8, [#allocation12]  }
  0x17   :  { %772 = dma.done.wait [#allocation3], 256  }
  0x18   :  { %773 = vsyncadd [#allocation3], 4294967040 }
  0x19   :  { %774 = dma.done.wait [#allocation6], 512  }
  0x1a   :  { %775 = vsyncadd [#allocation6], 4294966784 }
  0x1b   :  { %776 = dma.done.wait [#allocation9], 1536  }
  0x1c   :  { %777 = vsyncadd [#allocation9], 4294965760 }
  0x1d   :  { %778 = dma.done.wait [#allocation12], 640  }
  0x1e   :  { %779 = vsyncadd [#allocation12], 4294966656  ;;  %v151_v0 = vld [vmem:[#allocation8 + $0x18] sm:$0xff]  ;;  %v150_v1 = vld [vmem:[#allocation8 + $0x10] sm:$0xff]  ;;  %vm182_vm0 = vcmask 130048   ;;  %vm152_vm1 = vcmask 261120  }
  0x1f   :  { %171 = vmatpush.msra.mxu0 %v151_v0  ;;  %v145_v2 = vld [vmem:[#allocation7 + $0x8] sm:$0xff]  ;;  %v144_v3 = vld [vmem:[#allocation7] sm:$0xff]  ;;  %v149_v4 = vld [vmem:[#allocation8 + $0x8] sm:$0xff]  ;;  %vm226_vm2 = vcmask 523264   ;;  %s791_s6 = smov 96   ;;  %s794_s11 = smov 64  }
  0x20   :  { %203 = vmatpush.msra.mxu1 %v145_v2  ;;  %v142_v5 = vld [vmem:[#allocation2] sm:$0xff]  ;;  %v148_v6 = vld [vmem:[#allocation8] sm:$0xff]  ;;  %v224_v7 = vld [vmem:[#allocation10 + $0x38] sm:$0xff]  ;;  %s795_s12 = smov [#allocation14]   ;;  %s508_s3 = sshll.u32 %s952_s7, 4  ;;  %s509_s3 = int_to_ptr.hbm [resolvable:$true] %s508_s3 }
  0x21   :  { %172 = vmatpush.msra.mxu0 %v150_v1  ;;  %v146_v8 = vld [vmem:[#allocation5] sm:$0xff]  ;;  %v223_v9 = vld [vmem:[#allocation10 + $0x30] sm:$0xff]  ;;  %534 = vmatpush.msra.mxu2 %v224_v7  ;;  %v222_v10 = vld [vmem:[#allocation10 + $0x28] sm:$0xff]  ;;  %s506_s13 = sshll.u32 %s795_s12, 4  ;;  %s507_s13 = int_to_ptr.vmem [resolvable:$true] %s506_s13 }
  0x22   :  { %204 = vmatpush.msra.mxu1 %v144_v3  ;;  %v221_v11 = vld [vmem:[#allocation10 + $0x20] sm:$0xff]  ;;  %v143_v12 = vld [vmem:[#allocation2 + $0x8] sm:$0xff]  ;;  %v147_v13 = vld [vmem:[#allocation5 + $0x8] sm:$0xff] }
  0x23   :  { %173 = vmatpush.msra.mxu0 %v149_v4  ;;  %526 = vmatmul.msk.f32.vlgmr.msra.gmra.mxu1 %vm182_vm0, %v142_v5  ;;  %v220_v14 = vld [vmem:[#allocation10 + $0x18] sm:$0xff]  ;;  %v219_v15 = vld [vmem:[#allocation10 + $0x10] sm:$0xff]  ;;  %v218_v16 = vld [vmem:[#allocation10 + $0x8] sm:$0xff] }
  0x24   :  { %241 = vmatpush.msrb.mxu1 %v224_v7  ;;  %535 = vmatpush.msra.mxu2 %v223_v9  ;;  %v217_v17 = vld [vmem:[#allocation10] sm:$0xff] }
  0x25   :  { %174 = vmatpush.msra.mxu0 %v148_v6  ;;  %v560_v19 = vld [vmem:[#allocation13] ss:$0 sm:$0xff]  ;;  %v561_v29 = vld [vmem:[#allocation13 + $0x1] ss:$0 sm:$0xff]  ;;  %v562_v2 = vld [vmem:[#allocation13 + $0x2] ss:$0 sm:$0xff] }
  0x26   :  { %524 = vmatmul.msk.f32.vlgmr.msra.gmra.mxu0 %vm152_vm1, %v146_v8  ;;  %242 = vmatpush.msrb.mxu1 %v223_v9  ;;  %v563_v6 = vld [vmem:[#allocation13 + $0x3] ss:$0 sm:$0xff] }
  0x27   :  { %536 = vmatpush.msra.mxu2 %v222_v10 }
  0x28   :  { %243 = vmatpush.msrb.mxu1 %v222_v10 }
  0x29   :  { %537 = vmatpush.msra.mxu2 %v221_v11 }
  0x2a   :  { %244 = vmatpush.msrb.mxu1 %v221_v11  ;;  %v564_v11 = vld [vmem:[#allocation13 + $0x4] ss:$0 sm:$0xff] }
  0x2b   :  { %527 = vmatmul.msk.f32.gmra.mxu1 %vm182_vm0, %v143_v12  ;;  %538 = vmatpush.msra.mxu2 %v220_v14 }
  0x2c   :  { %245 = vmatpush.msrb.mxu1 %v220_v14 }
  0x2d   :  { %539 = vmatpush.msra.mxu2 %v219_v15 }
  0x2e   :  { %525 = vmatmul.msk.f32.gmra.mxu0 %vm152_vm1, %v147_v13  ;;  %246 = vmatpush.msrb.mxu1 %v219_v15 }
  0x2f   :  { %540 = vmatpush.msra.mxu2 %v218_v16 }
  0x30   :  { %247 = vmatpush.msrb.mxu1 %v218_v16 }
  0x31   :  { %541 = vmatpush.msra.mxu2 %v217_v17 }
  0x32   :  { %248 = vmatpush.msrb.mxu1 %v217_v17 }
  0xa0   :  { %v206_v18 = vpop.f32.mrf.mxu1 }
  0xa3   :  { %v176_v20 = vpop.f32.mrf.mxu0 }
  0xa4   :  { %v207_v21 = vadd.f32 %v206_v18, %v176_v20 }
  0xa6   :  { %v213_v22 = vadd.f32 %v560_v19, %v207_v21 }
  0xa8   :  { %v215_v23 = vmax.f32 %v213_v22, 0.0  ;;  %v209_v24 = vpop.f32.mrf.mxu1 }
  0xaa   :  { %528 = vmatmul.msk.f32.vlgmr.msrb.gmra.mxu1 %vm226_vm2, %v215_v23 }
  0xab   :  { %v179_v25 = vpop.f32.mrf.mxu0 }
  0xac   :  { %v210_v26 = vadd.f32 %v209_v24, %v179_v25 }
  0xae   :  { %v214_v27 = vadd.f32 %v560_v19, %v210_v26 }
  0xb0   :  { %v216_v28 = vmax.f32 %v214_v27, 0.0  ;;  %v915_v27 = vld [vmem:[#allocation13 + $0x6] ss:$0 sm:$0xff] }
  0xb2   :  { %529 = vmatmul.msk.f32.vlgmr.msra.gmra.mxu2 %vm226_vm2, %v216_v28  ;;  %v792_v28 = vmov 0  }
  0xb3   :  { %558 = vset.pattern.permute.xlu1 %v792_v28  ;;  %556 = vset.pattern.permute.xlu2 %v792_v28 }
  0xb4   :  { %557 = vset.pattern.permute.xlu0 %v792_v28 }
 0x127   :  { %v250_v30 = vpop.f32.mrf.mxu1 }
 0x128   :  { %v251_v31 = vadd.f32 %v561_v29, %v250_v30 }
 0x12a   :  { %v881_v32 = vmax.f32 %v251_v31, 0.0 }
 0x12c   :  { %260 = vrot.lane.b32.xlu1 %v881_v32, %s791_s6  ;;  %v274_v33 = vmul.f32 %v881_v32, %v881_v32 }
 0x12e   :  { %284 = vrot.lane.b32.xlu0 %v274_v33, %s791_s6  ;;  %v276_v34 = vsel %vm152_vm1, %v274_v33, 0.0 }
 0x12f   :  { %277 = vadd.xlane.f32.xlu2 %v276_v34 }
 0x135   :  { %v253_v35 = vpop.f32.mrf.mxu2 }
 0x136   :  { %v254_v36 = vadd.f32 %v561_v29, %v253_v35 }
 0x138   :  { %v889_v37 = vmax.f32 %v254_v36, 0.0 }
 0x13a   :  { %262 = vrot.lane.b32.xlu1 %v889_v37, %s791_s6  ;;  %v275_v38 = vmul.f32 %v889_v37, %v889_v37 }
 0x13c   :  { %286 = vrot.lane.b32.xlu0 %v275_v38, %s791_s6  ;;  %v279_v39 = vsel %vm152_vm1, %v275_v38, 0.0 }
 0x166   :  { %280 = vadd.xlane.f32.xlu0 %v279_v39 }
 0x19e   :  { %v261_v42 = vpop.permute.xlu1 %260 }
 0x19f   :  { %v266_v43 = vmul.f32 %v261_v42, %v881_v32 }
 0x1a0   :  { %v285_v40 = vpop.permute.xlu0 %284 }
 0x1a1   :  { %v290_v41 = vsel %vm152_vm1, %v285_v40, 0.0  ;;  %v268_v44 = vsel %vm152_vm1, %v266_v43, 0.0 }
 0x1a2   :  { %291 = vadd.xlane.f32.xlu2 %v290_v41  ;;  %v278_v50 = vpop.xlane.xlu2 %277 }
 0x1aa   :  { %269 = vadd.xlane.f32.xlu2 %v268_v44 }
 0x1ac   :  { %v263_v45 = vpop.permute.xlu1 %262 }
 0x1ad   :  { %v267_v46 = vmul.f32 %v263_v45, %v889_v37 }
 0x1ae   :  { %v287_v47 = vpop.permute.xlu0 %286 }
 0x1af   :  { %v293_v48 = vsel %vm152_vm1, %v287_v47, 0.0  ;;  %v271_v49 = vsel %vm152_vm1, %v267_v46, 0.0 }
 0x1b0   :  { %294 = vadd.xlane.f32.xlu1 %v293_v48 }
 0x1b2   :  { %272 = vadd.xlane.f32.xlu2 %v271_v49 }
 0x1d9   :  { %v281_v56 = vpop.xlane.xlu0 %280 }
 0x215   :  { %v292_v51 = vpop.xlane.xlu2 %291 }
 0x216   :  { %v296_v52 = vmul.f32 %v292_v51, %v278_v50 }
 0x218   :  { %v298_v53 = vmax.f32 %v296_v52, 1e-16 }
 0x21a   :  { %568 = vrsqrt.f32 %v298_v53  ;;  %vm306_vm4 = vweird.f32 %v298_v53 }
 0x21d   :  { %v270_v1 = vpop.xlane.xlu2 %269 }
 0x220   :  { %v569_v54 = vpop.eup %568 }
 0x221   :  { %v301_v55 = vmul.f32 %v569_v54, %v298_v53  ;;  %vm307_vm3 = vweird.f32 %v569_v54 }
 0x222   :  { %vm308_vm5 = vmor %vm306_vm4, %vm307_vm3 }
 0x223   :  { %v302_v57 = vmul.f32 %v569_v54, %v301_v55  ;;  %v295_v58 = vpop.xlane.xlu1 %294 }
 0x224   :  { %v297_v59 = vmul.f32 %v295_v58, %v281_v56 }
 0x225   :  { %v303_v60 = vmul.f32 0.5, %v302_v57  ;;  %v273_v19 = vpop.xlane.xlu2 %272 }
 0x226   :  { %v299_v61 = vmax.f32 %v297_v59, 1e-16 }
 0x227   :  { %v304_v62 = vsub.f32 1.5, %v303_v60 }
 0x228   :  { %570 = vrsqrt.f32 %v299_v61  ;;  %vm316_vm7 = vweird.f32 %v299_v61 }
 0x229   :  { %v305_v63 = vmul.f32 %v569_v54, %v304_v62 }
 0x22b   :  { %v309_v0 = vsel %vm308_vm5, %v569_v54, %v305_v63 }
 0x22c   :  { %v903_v3 = vmul.f32 %v309_v0, %v270_v1  ;;  %v421_v1 = vld [vmem:[#allocation11 + $0x18] sm:$0xff] }
 0x22d   :  { %441 = vmatpush.msra.mxu3 %v421_v1 }
 0x22e   :  { %v571_v4 = vpop.eup %570  ;;  %v322_v5 = vsub.f32 1.0, %v903_v3 }
 0x22f   :  { %v311_v7 = vmul.f32 %v571_v4, %v299_v61  ;;  %vm317_vm6 = vweird.f32 %v571_v4 }
 0x230   :  { %v325_v8 = vmul.f32 %v562_v2, %v322_v5  ;;  %vm318_vm8 = vmor %vm316_vm7, %vm317_vm6 }
 0x231   :  { %v312_v9 = vmul.f32 %v571_v4, %v311_v7 }
 0x232   :  { %v328_v10 = vadd.f32 %v563_v6, %v325_v8  ;;  %v418_v8 = vld [vmem:[#allocation11] sm:$0xff] }
 0x233   :  { %v313_v12 = vmul.f32 0.5, %v312_v9 }
 0x234   :  { %v330_v13 = vmax.f32 %v328_v10, 0.0 }
 0x235   :  { %v314_v14 = vsub.f32 1.5, %v313_v12 }
 0x236   :  { %v333_v15 = vmul.f32 %v564_v11, %v330_v13 }
 0x237   :  { %v315_v16 = vmul.f32 %v571_v4, %v314_v14 }
 0x238   :  { %v335_v17 = vsel %vm182_vm0, %v333_v15, 0.0 }
 0x239   :  { %v319_v18 = vsel %vm318_vm8, %v571_v4, %v315_v16  ;;  %336 = vadd.xlane.f32.xlu2 %v335_v17  ;;  %v419_v4 = vld [vmem:[#allocation11 + $0x8] sm:$0xff]  ;;  %v566_v17 = vld [vmem:[#allocation13 + $0x7] ss:$0 sm:$0xff] }
 0x23a   :  { %v909_v20 = vmul.f32 %v319_v18, %v273_v19 }
 0x23c   :  { %v323_v21 = vsub.f32 1.0, %v909_v20 }
 0x23e   :  { %v326_v22 = vmul.f32 %v562_v2, %v323_v21  ;;  %v420_v2 = vld [vmem:[#allocation11 + $0x10] sm:$0xff] }
 0x23f   :  { %442 = vmatpush.msra.mxu3 %v420_v2 }
 0x240   :  { %v329_v23 = vadd.f32 %v563_v6, %v326_v22  ;;  %v567_v22 = vld [vmem:[#allocation13 + $0x5] ss:$0 sm:$0xff] }
 0x241   :  { %443 = vmatpush.msra.mxu3 %v419_v4 }
 0x242   :  { %v331_v24 = vmax.f32 %v329_v23, 0.0 }
 0x243   :  { %444 = vmatpush.msra.mxu3 %v418_v8 }
 0x244   :  { %v334_v25 = vmul.f32 %v564_v11, %v331_v24 }
 0x246   :  { %v338_v26 = vsel %vm182_vm0, %v334_v25, 0.0 }
 0x247   :  { %339 = vadd.xlane.f32.xlu2 %v338_v26 }
 0x2ac   :  { %v337_v29 = vpop.xlane.xlu2 %336 }
 0x2ad   :  { %v342_v30 = vadd.f32 %v915_v27, %v337_v29 }
 0x2af   :  { %v530_v31 = vmul.f32 -1.442695, %v342_v30 }
 0x2b1   :  { %572 = vpow2.f32 %v530_v31 }
 0x2b7   :  { %v573_v33 = vpop.eup %572 }
 0x2b8   :  { %v350_v34 = vadd.f32 1.0, %v573_v33  ;;  %v793_v33 = vmov 1  }
 0x2ba   :  { %574 = vrcp.f32 %v350_v34  ;;  %v340_v35 = vpop.xlane.xlu2 %339  ;;  %v363_v42 = vand.u32 2147483648, %v350_v34  ;;  %v361_v45 = vand.u32 2147483647, %v350_v34  ;;  %vm357_vm10 = vweird.f32 %v350_v34 }
 0x2bb   :  { %v343_v36 = vadd.f32 %v915_v27, %v340_v35 }
 0x2bc   :  { %v364_v48 = vor.u32 1.1754944e-38, %v363_v42  ;;  %vm362_vm12 = vcmp.eq.f32.partialorder %v361_v45, 8.507059e+37 }
 0x2bd   :  { %v531_v38 = vmul.f32 -1.442695, %v343_v36 }
 0x2bf   :  { %576 = vpow2.f32 %v531_v38 }
 0x2c0   :  { %v575_v39 = vpop.eup %574 }
 0x2c1   :  { %v353_v40 = vmul.f32 %v575_v39, %v350_v34  ;;  %vm358_vm9 = vweird.f32 %v575_v39 }
 0x2c2   :  { %vm359_vm11 = vmor %vm357_vm10, %vm358_vm9 }
 0x2c3   :  { %v354_v41 = vsub.f32 1.0, %v353_v40 }
 0x2c5   :  { %v577_v43 = vpop.eup %576  ;;  %v355_v44 = vmul.f32 %v575_v39, %v354_v41 }
 0x2c6   :  { %v351_v46 = vadd.f32 1.0, %v577_v43 }
 0x2c7   :  { %v356_v47 = vadd.f32 %v575_v39, %v355_v44 }
 0x2c8   :  { %578 = vrcp.f32 %v351_v46  ;;  %v378_v55 = vand.u32 2147483648, %v351_v46  ;;  %v376_v57 = vand.u32 2147483647, %v351_v46  ;;  %vm372_vm14 = vweird.f32 %v351_v46 }
 0x2c9   :  { %v360_v49 = vsel %vm359_vm11, %v575_v39, %v356_v47  ;;  %v465_v39 = vlaneseq }
 0x2ca   :  { %v365_v50 = vsel %vm362_vm12, %v364_v48, %v360_v49  ;;  %v379_v59 = vor.u32 1.1754944e-38, %v378_v55  ;;  %vm377_vm0 = vcmp.eq.f32.partialorder %v376_v57, 8.507059e+37 }
 0x2cb   :  { %384 = vperm.xlu1 %558, %v365_v50   ;;  %v394_v51 = vsub.f32 1.0, %v365_v50  ;;  %v466_v40 = vand.u32 127, %v465_v39 }
 0x2cd   :  { %398 = vperm.xlu2 %556, %v394_v51   ;;  %vm467_vm3 = vcmp.eq.s32.totalorder %v466_v40, 0  ;;  %vm480_vm4 = vcmp.eq.s32.totalorder %v466_v40, 1  ;;  %vm485_vm5 = vcmp.eq.s32.totalorder %v466_v40, 2 }
 0x2ce   :  { %v579_v52 = vpop.eup %578  ;;  %v481_v42 = vsel %vm480_vm4, %v322_v5, 0.0 }
 0x2cf   :  { %v368_v53 = vmul.f32 %v579_v52, %v351_v46  ;;  %vm373_vm13 = vweird.f32 %v579_v52 }
 0x2d0   :  { %vm374_vm15 = vmor %vm372_vm14, %vm373_vm13 }
 0x2d1   :  { %v369_v54 = vsub.f32 1.0, %v368_v53 }
 0x2d3   :  { %v370_v56 = vmul.f32 %v579_v52, %v369_v54 }
 0x2d5   :  { %v371_v58 = vadd.f32 %v579_v52, %v370_v56 }
 0x2d7   :  { %v375_v60 = vsel %vm374_vm15, %v579_v52, %v371_v58 }
 0x2d8   :  { %v380_v61 = vsel %vm377_vm0, %v379_v59, %v375_v60 }
 0x2d9   :  { %v395_v62 = vsub.f32 1.0, %v380_v61 }
 0x2db   :  { %403 = vperm.xlu0 %557, %v395_v62  }
 0x2e3   :  { %559 = vset.pattern.permute.xlu0 %v793_v33 }
 0x327   :  { %v399_v63 = vpop.permute.xlu2 %398 }
 0x328   :  { %v406_v0 = vmul.f32 %v399_v63, %v881_v32 }
 0x32a   :  { %410 = vrot.lane.b32.xlu2 %v406_v0, %s791_s6 }
 0x332   :  { %389 = vperm.xlu2 %556, %v380_v61  }
 0x33d   :  { %v385_v9 = vpop.permute.xlu1 %384 }
 0x33e   :  { %v392_v10 = vmul.f32 %v385_v9, %v881_v32  ;;  %v486_v45 = vsel %vm485_vm5, %v385_v9, 0.0 }
 0x34d   :  { %v404_v6 = vpop.permute.xlu0 %403 }
 0x34e   :  { %v407_v7 = vmul.f32 %v404_v6, %v889_v37 }
 0x350   :  { %412 = vrot.lane.b32.xlu1 %v407_v7, %s791_s6 }
 0x384   :  { %v411_v11 = vpop.permute.xlu2 %410 }
 0x385   :  { %v416_v12 = vadd.f32 %v411_v11, %v392_v10 }
 0x387   :  { %532 = vmatmul.msk.f32.vlgmr.msra.gmra.mxu3 %vm152_vm1, %v416_v12 }
 0x38c   :  { %v390_v13 = vpop.permute.xlu2 %389 }
 0x38d   :  { %v393_v14 = vmul.f32 %v390_v13, %v889_v37  ;;  %v487_v50 = vsel %vm485_vm5, %v390_v13, 0.0 }
 0x3c2   :  { %v413_v15 = vpop.permute.xlu1 %412 }
 0x3c3   :  { %v417_v16 = vadd.f32 %v413_v15, %v393_v14 }
 0x3c5   :  { %533 = vmatmul.msk.f32.gmra.mxu3 %vm152_vm1, %v417_v16 }
 0x40a   :  { %v446_v18 = vpop.f32.mrf.mxu3 }
 0x40b   :  { %v447_v19 = vadd.f32 %v566_v17, %v446_v18 }
 0x40d   :  { %v452_v23 = vmax.f32 %v447_v19, 0.0 }
 0x40f   :  { %v455_v24 = vmul.f32 %v567_v22, %v452_v23 }
 0x411   :  { %v457_v25 = vsel %vm152_vm1, %v455_v24, 0.0 }
 0x412   :  { %458 = vadd.xlane.f32.xlu2 %v457_v25 }
 0x448   :  { %v449_v26 = vpop.f32.mrf.mxu3 }
 0x449   :  { %v450_v28 = vadd.f32 %v566_v17, %v449_v26 }
 0x44b   :  { %v453_v29 = vmax.f32 %v450_v28, 0.0 }
 0x44d   :  { %v456_v30 = vmul.f32 %v567_v22, %v453_v29 }
 0x44f   :  { %v460_v31 = vsel %vm152_vm1, %v456_v30, 0.0 }
 0x450   :  { %461 = vadd.xlane.f32.xlu1 %v460_v31 }
 0x485   :  { %v459_v34 = vpop.xlane.xlu2 %458 }
 0x486   :  { %v463_v35 = vadd.f32 %v915_v27, %v459_v34 }
 0x488   :  { %470 = vperm.xlu0 %559, %v463_v35  }
 0x4c3   :  { %v462_v36 = vpop.xlane.xlu1 %461 }
 0x4c4   :  { %v464_v38 = vadd.f32 %v915_v27, %v462_v36  ;;  %v482_v27 = vsel %vm480_vm4, %v323_v21, 0.0 }
 0x4c6   :  { %475 = vperm.xlu0 %559, %v464_v38  }
 0x4fa   :  { %v471_v41 = vpop.permute.xlu0 %470 }
 0x4fb   :  { %v478_v43 = vsel %vm467_vm3, %v471_v41, 0.0 }
 0x4fc   :  { %v483_v44 = vadd.f32 %v481_v42, %v478_v43 }
 0x4fe   :  { %v488_v46 = vadd.f32 %v486_v45, %v483_v44 }
 0x500   :  { %492 = vrot.lane.b32.xlu0 %v488_v46, %s794_s11 }
 0x538   :  { %v476_v47 = vpop.permute.xlu0 %475 }
 0x539   :  { %v479_v48 = vsel %vm467_vm3, %v476_v47, 0.0 }
 0x53a   :  { %v484_v49 = vadd.f32 %v482_v27, %v479_v48 }
 0x53c   :  { %v489_v51 = vadd.f32 %v487_v50, %v484_v49 }
 0x53e   :  { %494 = vrot.lane.b32.xlu2 %v489_v51, %s794_s11 }
 0x572   :  { %v493_v52 = vpop.permute.xlu0 %492 }
 0x573   :  { %v498_v3 = vsel %vm226_vm2, %v881_v32, %v493_v52 }
 0x574   :  { %500 = vst [vmem:[#allocation14] sm:$0xff] %v498_v3 }
 0x598   :  { %v495_v5 = vpop.permute.xlu2 %494 }
 0x599   :  { %v499_v20 = vsel %vm226_vm2, %v889_v37, %v495_v5 }
 0x59a   :  { %501 = vst [vmem:[#allocation14 + $0x8] sm:$0xff] %v499_v20 }
 0x59b   :  { %514 = dma.vmem_to_hbm [thread:$0]  %s507_s13, 256, %s509_s3, [#allocation4], %s783_s9, %s783_s9, %s784_s10  }
 0x59c   :  { %780 = dma.done.wait [#allocation4], 256  }
 0x59d   :  { %781 = vsyncadd [#allocation4], 4294967040 }
 0x59e   :  { %519 = vsyncpa [#allocation3], 1 }
 0x59f   :  { %520 = vsyncpa [#allocation6], 1 }
 0x5a0   :  { %521 = vsyncpa [#allocation9], 1 }
 0x5a1   :  { %522 = vsyncpa [#allocation12], 1 }
 0x5a2   :  { %523 = vsyncpa [#allocation4], 1 }

</bundles_post_ra>
